<compile_context>
chip_gen: v6e
topology: v6e:2x2x1
jax: 0.10.0
libtpu: 0.0.40
codegen_flags: <defaults>
</compile_context>

<pallas_src>
import jax
import jax.numpy as jnp
from jax.experimental import pallas as pl
from jax.experimental.pallas import tpu as pltpu

_LANE = 128
_TARGET_BLOCK_BYTES = 4 * 1024 * 1024    # per-block footprint (dtype-invariant)
_VMEM_LIMIT_BYTES = 32 * 1024 * 1024     # explicit: safe on v5e/v6e/v7x


def _relu_poly_kernel(x_ref, o_ref):
    # Compute in f32 regardless of input dtype; cast only on store.
    x = x_ref[...].astype(jnp.float32)
    y = (jnp.float32(0.09) * x + jnp.float32(0.5)) * x + jnp.float32(0.47)
    o_ref[...] = y.astype(o_ref.dtype)


def _round_up(a, b):
    return ((a + b - 1) // b) * b


def relu_poly(x, *, target_block_bytes=_TARGET_BLOCK_BYTES):
    """Applies 0.09*x^2 + 0.5*x + 0.47 elementwise via a Pallas TPU kernel."""
    orig_shape = x.shape
    dtype = x.dtype
    total = x.size
    if total == 0:
        return x

    itemsize = jnp.dtype(dtype).itemsize
    cost = pl.CostEstimate(
        flops=4 * total,                      # 2 mul + 2 add per element (Horner)
        transcendentals=0,
        bytes_accessed=2 * total * itemsize,  # one read + one write
    )
    cparams = pltpu.CompilerParams(
        dimension_semantics=("parallel",),
        vmem_limit_bytes=_VMEM_LIMIT_BYTES,
    )
    # Sublane packing: f32 -> 8 rows, bf16 -> 16, int8/fp8 -> 32.
    pack = max(1, 4 // itemsize)

    flat = x.reshape(-1)  # row-major bitcast, no copy

    if total % _LANE == 0:
        # ---- lane-dense 2-D slab path (aligned totals) ----
        rows = total // _LANE
        slab = flat.reshape(rows, _LANE)
        row_align = 8 * pack
        target_rows = max(row_align, target_block_bytes // (_LANE * itemsize))
        if rows <= row_align:
            tr = rows  # full extent (allowed even if not a multiple of 8)
        else:
            # >= 2 blocks when possible (feeds both v7x TensorCores), capped
            # at the dtype-invariant byte budget.
            tr = min(target_rows, _round_up(pl.cdiv(rows, 2), row_align))
        grid = (pl.cdiv(rows, tr),)

        out2d = pl.pallas_call(
            _relu_poly_kernel,
            out_shape=jax.ShapeDtypeStruct((rows, _LANE), dtype),
            grid_spec=pltpu.PrefetchScalarGridSpec(
                num_scalar_prefetch=0,
                grid=grid,
                in_specs=[pl.BlockSpec((tr, _LANE), lambda i: (i, 0))],
                out_specs=pl.BlockSpec((tr, _LANE), lambda i: (i, 0)),
            ),
            compiler_params=cparams,
            cost_estimate=cost,
        )(slab)
        return out2d.reshape(orig_shape)

    # ---- rank-1 path (unaligned totals): one pallas_call, ragged last block
    #      is masked by Pallas; no slice / pad / concatenate HBM passes. ----
    elem_align = _LANE * 8 * pack
    target_elems = max(elem_align, target_block_bytes // itemsize)
    if total <= 2 * elem_align:
        te = total  # single full-extent block
    else:
        te = min(target_elems, _round_up(pl.cdiv(total, 2), elem_align))
    grid = (pl.cdiv(total, te),)

    out_flat = pl.pallas_call(
        _relu_poly_kernel,
        out_shape=jax.ShapeDtypeStruct((total,), dtype),
        grid_spec=pltpu.PrefetchScalarGridSpec(
            num_scalar_prefetch=0,
            grid=grid,
            in_specs=[pl.BlockSpec((te,), lambda i: (i,))],
            out_specs=pl.BlockSpec((te,), lambda i: (i,))
        ),
        compiler_params=cparams,
        cost_estimate=cost,
    )(flat)
    return out_flat.reshape(orig_shape)


def _poly_ref(x):
    return 0.09 * jnp.power(x, 2) + 0.5 * x + 0.47


if __name__ == "__main__":
    key = jax.random.PRNGKey(0)
    k1, k2 = jax.random.split(key)

    # NCHW input matching the PyTorch module; total is 128-aligned -> 2-D slab
    # path with a 2-block parallel grid.
    x = jax.random.normal(key, (2, 4, 16, 16), dtype=jnp.float32)
    y = jax.block_until_ready(relu_poly(x))
    assert y.shape == x.shape and y.dtype == x.dtype
    assert jnp.allclose(y, _poly_ref(x), atol=1e-6, rtol=1e-6)

    # Non-128-aligned total (small): rank-1 full-extent single block.
    x2 = jax.random.normal(k1, (3, 5, 7, 11), dtype=jnp.float32)
    y2 = jax.block_until_ready(relu_poly(x2))
    assert jnp.allclose(y2, _poly_ref(x2), atol=1e-6, rtol=1e-6)

    # Non-128-aligned total (larger): rank-1 grid with a ragged, masked last
    # block — exercises the no-extra-HBM-pass tail handling.
    x3 = jax.random.normal(k2, (3, 1000), dtype=jnp.float32)
    y3 = jax.block_until_ready(relu_poly(x3))
    assert jnp.allclose(y3, _poly_ref(x3), atol=1e-6, rtol=1e-6)

    print("KERNEL_OK")
</pallas_src>

<mosaic_0001>
module attributes {stable_mosaic.version = 11 : i64} {
  func.func @_relu_poly_kernel(%arg0: i32, %arg1: memref<8x128xf32, #tpu.memory_space<vmem>>, %arg2: memref<8x128xf32, #tpu.memory_space<vmem>>) attributes {dimension_semantics = [#tpu.dimension_semantics<parallel>], iteration_bounds = array<i64: 2>, scalar_prefetch = 0 : i64, scratch_operands = 0 : i64, tpu.core_type = #tpu.core_type<tc>, window_params = [{transform_indices = @transform_0, window_bounds = array<i64: 8, 128>}, {transform_indices = @transform_1, window_bounds = array<i64: 8, 128>}]} {
    %c0 = arith.constant 0 : index
    %c0_0 = arith.constant 0 : index
    %0 = vector.load %arg1[%c0, %c0_0] : memref<8x128xf32, #tpu.memory_space<vmem>>, vector<8x128xf32>
    %cst = arith.constant 9.000000e-02 : f32
    %1 = vector.broadcast %cst : f32 to vector<8x128xf32>
    %2 = arith.mulf %1, %0 : vector<8x128xf32>
    %cst_1 = arith.constant 5.000000e-01 : f32
    %3 = vector.broadcast %cst_1 : f32 to vector<8x128xf32>
    %4 = arith.addf %2, %3 : vector<8x128xf32>
    %5 = arith.mulf %4, %0 : vector<8x128xf32>
    %cst_2 = arith.constant 4.700000e-01 : f32
    %6 = vector.broadcast %cst_2 : f32 to vector<8x128xf32>
    %7 = arith.addf %5, %6 : vector<8x128xf32>
    %c0_3 = arith.constant 0 : index
    %c0_4 = arith.constant 0 : index
    %8 = vector.load %arg2[%c0_3, %c0_4] : memref<8x128xf32, #tpu.memory_space<vmem>>, vector<8x128xf32>
    tpu.vector_store %arg2[%c0_3, %c0_4], %7 {strides = array<i32>} : memref<8x128xf32, #tpu.memory_space<vmem>>, vector<8x128xf32>,
    return
  }
  func.func @transform_0(%arg0: i32) -> (i32, i32) {
    %c0_i32 = arith.constant 0 : i32
    %c0_i32_0 = arith.constant 0 : i32
    return %arg0, %c0_i32 : i32, i32
  }
  func.func @transform_1(%arg0: i32) -> (i32, i32) {
    %c0_i32 = arith.constant 0 : i32
    %c0_i32_0 = arith.constant 0 : i32
    return %arg0, %c0_i32 : i32, i32
  }
}

</mosaic_0001>

<bundles_post_ra>
// kernel: tpu_custom_call.1
= control target key start
LH: loop header
LB: loop body
LE: loop exit
PB: predicated region body
PF: predicated region fallthrough
CT: control target
= control target key end

     0   :  { %6 = vsyncpa [#allocation3], 0  ;;  %s527_s0 = inlined_call_operand.hbm [shape: f32[16,128], index: 0, kind: input, shape index: {}]   ;;  %s528_s1 = inlined_call_operand.hbm [shape: f32[16,128], index: 1, kind: output, shape index: {}]  }
   0x1   :  { %8 = vsyncpa [#allocation3 + $0x1], 0 }
   0x2   :  { %9 = vsyncpa [#allocation4], 0 }
   0x3   :  { %11 = vsyncpa [#allocation4 + $0x1], 0  ;;  %s386_s6 = smov 0   ;;  %s388_s7 = smov 0  }
   0x4   :  { %s390_s8 = smov 0   ;;  %s392_s9 = smov 0  }
   0x5 LB: > { %s407_s10 = sadd.s32 4294967295, %s372_s9   ;;  %s222_s11 = sadd.s32 4294967294, %s372_s9   ;;  %s372_s9 = sphi %s392_s9, %s545_s9   ;;  %s368_s8 = sphi %s390_s8, %s544_s8   ;;  %s364_s7 = sphi %s388_s7, %s543_s7   ;;  %s360_s6 = sphi %s386_s6, %s542_s6  }
   0x6   : > { %s411_s12 = sadd.s32 1, %s372_s9   ;;  %s24_s13 = sadd.s32 1, %s368_s8 }
   0x7   : > { %s21_s14 = ssub.s32 %s372_s9, %s411_s12  ;;  %p31_p0 = scmp.ne.s32.totalorder %s368_s8, %s364_s7 }
   0x8   : > { %p22_p1 = scmp.eq.s32.totalorder %s21_s14, 0  ;;  %p32_p2 = scmp.eq.s32.totalorder %s372_s9, 0 }
   0x9   : > { %p37_p3 = scmp.ne.s32.totalorder %s364_s7, %s360_s6  ;;  %p38_p4 = scmp.eq.s32.totalorder %s407_s10, 0 }
   0xa   : > { %s423_s15 = scalar_select %p22_p1, %s368_s8, %s24_s13  }
   0xb   : > { %p425_p5 = por %p32_p2, %p31_p0  ;;  %p429_p6 = por %p38_p4, %p37_p3 }
   0xc   : > { %p61_p7 = scmp.eq.s32.totalorder %s407_s10, 1  ;;  %p67_p8 = scmp.eq.s32.totalorder %s222_s11, 1 }
   0xd   : > { %s532_s17 = scalar_select %p429_p6, 1, 0 }
   0xe   : > { %p246_p10 = scmp.lt.s32.totalorder %s372_s9, 2  ;;  %p436_p11 = por %p61_p7, %p31_p0 }
   0xf   : > { %p440_p12 = por %p67_p8, %p37_p3  ;;  %s87_s20 = sand.u32 1, %s368_s8  }
  0x10   : > { %s533_s18 = scalar_select %p436_p11, 1, 0 }
  0x11   : > { %s534_s19 = scalar_select %p440_p12, 1, 0 }
  0x12   : > { %s226_s21 = sshll.u32 %s372_s9, 7  ;;  %s225_s22 = sshll.u32 %s87_s20, 3 }
  0x13   : > { %s449_s25 = scalar_lea.hbm %s527_s0, %s226_s21  ;;  %s91_s26 = scalar_lea.vmem [#allocation2], %s225_s22 }
  0x14   : > { %s98_s27 = sshll.u32 %s91_s26, 4  ;;  %p453_p13 = pnand %p246_p10, %p425_p5  ;;  %s457_s27 = int_to_ptr.vmem [resolvable:$true] %s98_s27 }
  0x15   : > { %s88_s29 = scalar_lea.sflag [#allocation3], %s87_s20  ;;  %s280_s30 = scalar_lea.hbm %s449_s25, 128 }
  0x16   : > { %p281_p2 = scmp.ne.s32.totalorder %s449_s25, %s280_s30  ;;  %p282_p3 = pneg %p453_p13 }
  0x17   : > { %s285_s4 = scalar_lea.hbm %s527_s0, 256  ;;  %p286_p5 = scmp.lt.s32.totalorder %s449_s25, %s527_s0 }
  0x18   : > { %p283_p4 = pnand %p282_p3, %p281_p2  ;;  %p287_p8 = scmp.lt.s32.totalorder %s285_s4, %s280_s30 }
  0x1a   : > { %p284_p7 = pneg %p283_p4  ;;  %p288_p10 = por %p287_p8, %p286_p5 }
  0x1c   : > { %p289_p9 = pnand %p288_p10, %p284_p7 }
  0x1e   : > { %292 = shalt.err (!%p289_p9)
}
  0x1f   : > { %s293_s13 = scalar_lea.vmem %s457_s27, 128  ;;  %s374_s14 = smov [#allocation2]  }
  0x20   : > { %p294_p0 = scmp.ne.s32.totalorder %s457_s27, %s293_s13  ;;  %s298_s16 = sshll.u32 %s374_s14, 4  ;;  %s299_s16 = int_to_ptr.vmem [resolvable:$false] %s298_s16 }
  0x21   : > { %s300_s20 = scalar_lea.vmem %s299_s16, 256  ;;  %p301_p4 = scmp.lt.s32.totalorder %s457_s27, %s299_s16 }
  0x22   : > { %p296_p1 = pnand %p294_p0, %p282_p3  ;;  %p302_p12 = scmp.lt.s32.totalorder %s300_s20, %s293_s13 }
  0x24   : > { %p297_p2 = pneg %p296_p1  ;;  %p303_p11 = por %p302_p12, %p301_p4 }
  0x26   : > { %p304_p6 = pnand %p303_p11, %p297_p2 }
  0x28   : > { %307 = shalt.err (!%p304_p6)
}
  0x29   : > { %241 = dma.hbm_to_vmem [thread:$0]  (!%p453_p13), %s449_s25, 128, %s457_s27, %s88_s29  }
  0x2a   : > { %p536_p9 = scmp.lt.s32.totalorder %s372_s9, 3  ;;  %p537_p7 = scmp.ge.s32.totalorder %s372_s9, 1 }
  0x2c   : > { %p104_p0 = pnand %p537_p7, %p536_p9 }
  0x2d   : > { %s484_s21 = sand.u32 (!%p104_p0), 1, %s364_s7   ;;  %p538_p6 = scmp.ne.s32.totalorder (!%p104_p0), %s532_s17, 0 }
  0x2e   : > { %107 = sbr.rel (%p104_p0) target bundleno = 77 (0x4d), region = 24  ;;  %s228_s22 = sshll.u32 (!%p104_p0), %s484_s21, 3 }
  0x2f   : > { %s110_s23 = scalar_lea.sflag (!%p104_p0), [#allocation3], %s484_s21  ;;  %s113_s24 = scalar_lea.vmem (!%p104_p0), [#allocation2], %s228_s22 }
  0x33   : > { %351 = dma.done.wait (%p538_p6), %s110_s23, 128  }
  0x34   : > { %353 = vsyncadd (%p538_p6), %s110_s23, 4294967168  ;;  %v132_v0 = vld [vmem:[%s113_s24] sm:$0xff]  ;;  %s131_s25 = scalar_lea.vmem [#allocation5], %s228_s22  ;;  %s231_s27 = sshll.u32 %s407_s10, 7 }
  0x35   : > { %v133_v1 = vmul.f32 0.09, %v132_v0  ;;  %s152_s26 = sshll.u32 %s131_s25, 4  ;;  %s150_s30 = scalar_lea.hbm %s528_s1, %s231_s27  ;;  %s153_s26 = int_to_ptr.vmem [resolvable:$true] %s152_s26 }
  0x36   : > { %s139_s2 = scalar_lea.sflag [#allocation4], %s484_s21  ;;  %s308_s17 = scalar_lea.vmem %s153_s26, 128 }
  0x37   : > { %v134_v2 = vadd.f32 0.5, %v133_v1  ;;  %p309_p11 = scmp.ne.s32.totalorder %s153_s26, %s308_s17  ;;  %p539_p12 = scmp.ne.s32.totalorder %s533_s18, 0 }
  0x38   : > { %s375_s3 = smov [#allocation5]  }
  0x39   : > { %v135_v3 = vmul.f32 %v134_v2, %v132_v0  ;;  %p310_p13 = pnand %p309_p11, %p539_p12  ;;  %s312_s4 = sshll.u32 %s375_s3, 4  ;;  %s313_s4 = int_to_ptr.vmem [resolvable:$false] %s312_s4 }
  0x3a   : > { %s314_s5 = scalar_lea.vmem %s313_s4, 256  ;;  %p315_p3 = scmp.lt.s32.totalorder %s153_s26, %s313_s4 }
  0x3b   : > { %v136_v4 = vadd.f32 0.47, %v135_v3  ;;  %p311_p1 = pneg %p310_p13  ;;  %p316_p5 = scmp.lt.s32.totalorder %s314_s5, %s308_s17 }
  0x3d   : > { %137 = vst [vmem:[%s131_s25] sm:$0xff] %v136_v4  ;;  %p317_p8 = por %p316_p5, %p315_p3 }
  0x3f   : > { %p318_p10 = pnand %p317_p8, %p311_p1 }
  0x41   : > { %321 = shalt.err (!%p318_p10)
}
  0x42   : > { %s322_s10 = scalar_lea.hbm %s150_s30, 128  ;;  %s326_s14 = scalar_lea.hbm %s528_s1, 256 }
  0x43   : > { %p323_p2 = scmp.ne.s32.totalorder %s150_s30, %s322_s10  ;;  %p327_p7 = scmp.lt.s32.totalorder %s150_s30, %s528_s1 }
  0x44   : > { %p328_p0 = scmp.lt.s32.totalorder %s326_s14, %s322_s10 }
  0x45   : > { %p324_p4 = pnand %p323_p2, %p539_p12 }
  0x46   : > { %p329_p6 = por %p328_p0, %p327_p7 }
  0x47   : > { %p325_p9 = pneg %p324_p4 }
  0x49   : > { %p330_p11 = pnand %p329_p6, %p325_p9 }
  0x4b   : > { %333 = shalt.err (!%p330_p11)
}
  0x4c   : > { %236 = dma.vmem_to_hbm [thread:$0]  (%p539_p12), %s153_s26, 128, %s150_s30, %s139_s2  }
  0x4d PF: > { %s164_s21 = sand.u32 1, %s360_s6   ;;  %p540_p13 = scmp.ne.s32.totalorder %s534_s19, 0 }
  0x4e   : > { %p541_p1 = scmp.ge.s32.totalorder %s372_s9, 2  ;;  %s165_s22 = scalar_lea.sflag [#allocation4], %s164_s21 }
  0x50   : > { %p243_p3 = pnand %p541_p1, %p540_p13 }
  0x52   : > { %p244_p5 = pneg %p243_p3 }
  0x54   : > { %355 = dma.done.wait (%p244_p5), %s165_s22, 128  }
  0x55   : > { %357 = vsyncadd (%p244_p5), %s165_s22, 4294967168  ;;  %p14_p8 = scmp.ge.s32.totalorder %s411_s12, 4   ;;  %s542_s6 = smov %s364_s7 }
  0x56   : > { %s543_s7 = smov %s368_s8  ;;  %s544_s8 = smov %s423_s15 }
  0x57   : > { %s545_s9 = smov %s411_s12  ;;  %16 = sbr.rel (!%p14_p8) target bundleno = 5 (0x5), region = 69 }
  0x5c   :  { %170 = vsyncpa [#allocation3], 1 }
  0x5d   :  { %172 = vsyncpa [#allocation3 + $0x1], 1 }
  0x5e   :  { %173 = vsyncpa [#allocation4], 1 }
  0x5f   :  { %175 = vsyncpa [#allocation4 + $0x1], 1 }

</bundles_post_ra>
